<compile_context>
chip_gen: v6e
topology: v6e:2x2x1
jax: 0.10.0
libtpu: 0.0.40
codegen_flags: <defaults>
</compile_context>

<pallas_src>
import functools

import jax
import jax.numpy as jnp
import numpy as np
from jax.experimental import pallas as pl
from jax.experimental.pallas import tpu as pltpu

N_EMBD = 32
BLOCK_SIZE = 8
HEAD_SIZE = 4
NUM_HEADS = 8
LN_EPS = 1e-5
NEG_INF = -1e30
LANES = 128


def transformer_kernel(x_ref, w_in_ref, w2_ref, const_ref, hmask_ref, o_ref, *, batch):
    B = batch
    T = BLOCK_SIZE
    C = N_EMBD
    H = NUM_HEADS
    BT = B * T
    G = H * BT                      # grouped (head, batch, query) axis; r = h*BT + b*T + i
    NBLK = LANES // C               # lane-packing factor for the output
    R = BT // NBLK                  # output rows after lane packing

    x = x_ref[...]                  # (BT, C)
    w_in = w_in_ref[...]            # (C, 8C) = [Wq | Wk | Wv | Wproj | W1]
    w2 = w2_ref[...]                # (4C, C)

    wqkv = w_in[:, 0:3 * C]
    wproj = w_in[:, 3 * C:4 * C]
    w1 = w_in[:, 4 * C:8 * C]

    ln1_g = const_ref[0:1, :C]
    ln1_b = const_ref[1:2, :C]
    ln2_g = const_ref[2:3, :C]
    ln2_b = const_ref[3:4, :C]
    bproj = const_ref[4:5, :C]
    b2 = const_ref[5:6, :C]
    b1 = const_ref[6:7, :]          # (1, 4C)
    bias = const_ref[8:8 + BT, :G]  # (BT, G) additive causal/same-batch mask (precomputed)
    head_mask = hmask_ref[...]      # (G, C)  1.0 where column c belongs to row r's head

    def layer_norm(z, g, b):
        mu = jnp.mean(z, axis=-1, keepdims=True)
        var = jnp.mean((z - mu) ** 2, axis=-1, keepdims=True)
        return (z - mu) * jax.lax.rsqrt(var + LN_EPS) * g + b

    # ---------------- Multi-head causal attention ----------------
    h1 = layer_norm(x, ln1_g, ln1_b)
    qkv = jnp.dot(h1, wqkv, preferred_element_type=jnp.float32)          # fused QKV (BT, 3C)
    q = qkv[:, 0:C]
    k = qkv[:, C:2 * C]
    v = qkv[:, 2 * C:3 * C]

    # Grouped queries: replicate q over the head axis (broadcast, no concatenate)
    # and keep only each group-row's own head's feature columns.
    q_g = jnp.broadcast_to(q, (H, BT, C)).reshape(G, C) * head_mask      # (G, C)

    # Lane-dense scores: keys on the sublane axis (BT), grouped queries on the
    # 128-wide lane axis (G).  s[n, r] = k[n] . q_g[r] (only head-h channels survive).
    s = jax.lax.dot_general(k, q_g, (((1,), (1,)), ((), ())),
                            preferred_element_type=jnp.float32)          # (BT, G)
    # NOTE: spec scales by 1/sqrt(n_embd), not 1/sqrt(head_size).
    s = s * (1.0 / (C ** 0.5)) + bias

    # Column softmax over the key (sublane) axis — 2 dense vregs of work.
    m = jnp.max(s, axis=0, keepdims=True)
    p = jnp.exp(s - m)
    denom = jnp.sum(p, axis=0, keepdims=True)
    p = p * pl.reciprocal(denom, approx=False)   # exact: keeps 1e-5 parity with the f32 reference

    # Per-(head, batch, query) context: contract over keys (axis 0 of both operands).
    pv = jax.lax.dot_general(p, v, (((0,), (0,)), ((), ())),
                             preferred_element_type=jnp.float32)         # (G, C)
    pv = pv * head_mask

    # Head re-gather: head_mask already zeroed cross-head columns, so summing the H
    # grouped copies (static sublane slices, pure VPU adds) rebuilds the
    # head-concatenated (BT, C) layout — no selector matmul.
    att = pv[0:BT]
    for h in range(1, H):
        att = att + pv[h * BT:(h + 1) * BT]

    att = jnp.dot(att, wproj, preferred_element_type=jnp.float32) + bproj
    # TODO(synk): dropout omitted (identity in eval mode)
    x1 = x + att                                                         # residual 1

    # ---------------- FeedForward ----------------
    h2 = layer_norm(x1, ln2_g, ln2_b)
    f = jnp.dot(h2, w1, preferred_element_type=jnp.float32) + b1         # (BT, 4C)
    f = jnp.maximum(f, 0.0)
    y = jnp.dot(f, w2, preferred_element_type=jnp.float32) + b2          # (BT, C)
    # TODO(synk): dropout omitted (identity in eval mode)

    z = x1 + y                                                           # residual 2, (BT, C)

    # Lane-dense store: pack (BT, C) into (R, 128) by laying NBLK consecutive
    # row-groups side by side along lanes (static slices + lane concat only).
    o_ref[...] = jnp.concatenate([z[j * R:(j + 1) * R] for j in range(NBLK)], axis=1)


def _make_masks(batch):
    """Constant masks (depend only on shapes) — built host-side, DMA'd in."""
    B, T, C, H, HS = batch, BLOCK_SIZE, N_EMBD, NUM_HEADS, HEAD_SIZE
    BT, G = B * T, H * B * T
    r = np.arange(G)                 # grouped index r = h*BT + b*T + i
    n = np.arange(BT)                # key index     n = b'*T + j
    qb, qi = (r // T) % B, r % T
    kb, kj = n // T, n % T
    ok = (kb[:, None] == qb[None, :]) & (kj[:, None] <= qi[None, :])
    bias = np.where(ok, 0.0, NEG_INF).astype(np.float32)                 # (BT, G)
    head_mask = ((r // BT)[:, None] == (np.arange(C) // HS)[None, :]).astype(np.float32)  # (G, C)
    return bias, head_mask


def pack_params(params, batch):
    """One-time packing: 13 module parameters + constant masks -> 4 arrays.
    Hoisted out of the per-call path."""
    C = N_EMBD
    BT = batch * BLOCK_SIZE
    wqkv = np.concatenate([np.asarray(params["wq"]), np.asarray(params["wk"]),
                           np.asarray(params["wv"])], axis=1)            # (C, 3C)
    w_in = np.concatenate([wqkv, np.asarray(params["wproj"]),
                           np.asarray(params["w1"])], axis=1)            # (C, 8C)

    bias, head_mask = _make_masks(batch)
    assert bias.shape[1] <= 4 * C
    const = np.zeros((8 + BT, 4 * C), np.float32)
    const[0, :C] = np.asarray(params["ln1_g"])[0]
    const[1, :C] = np.asarray(params["ln1_b"])[0]
    const[2, :C] = np.asarray(params["ln2_g"])[0]
    const[3, :C] = np.asarray(params["ln2_b"])[0]
    const[4, :C] = np.asarray(params["bproj"])[0]
    const[5, :C] = np.asarray(params["b2"])[0]
    const[6, :] = np.asarray(params["b1"])[0]
    const[8:8 + BT, :bias.shape[1]] = bias

    return (jnp.asarray(w_in), jnp.asarray(params["w2"]),
            jnp.asarray(const), jnp.asarray(head_mask))


@jax.jit
def transformer_forward(x, w_in, w2, const, head_mask):
    B, T, C = x.shape
    assert T == BLOCK_SIZE and C == N_EMBD
    BT = B * T
    assert NUM_HEADS * BT <= 4 * C, "grouped (head,batch,query) axis must fit the bias slab"
    assert (BT * C) % LANES == 0 and BT % (LANES // C) == 0

    NBLK = LANES // C
    R = BT // NBLK

    x2 = x.reshape(BT, C)            # (B*T, C) slab
    vmem = pl.BlockSpec(memory_space=pltpu.MemorySpace.VMEM)
    out2 = pl.pallas_call(
        functools.partial(transformer_kernel, batch=B),
        out_shape=jax.ShapeDtypeStruct((R, LANES), jnp.float32),
        in_specs=[vmem, vmem, vmem, vmem, vmem],
        out_specs=vmem,
    )(x2, w_in, w2, const, head_mask)
    # undo the lane packing: out2[a, j*C + c] == z[j*R + a, c]
    return out2.reshape(R, NBLK, C).transpose(1, 0, 2).reshape(B, T, C)


def init_params(key):
    ks = jax.random.split(key, 8)
    scale = 0.02
    return {
        "ln1_g": jnp.ones((1, N_EMBD), jnp.float32),
        "ln1_b": jnp.zeros((1, N_EMBD), jnp.float32),
        "wq": scale * jax.random.normal(ks[0], (N_EMBD, NUM_HEADS * HEAD_SIZE), jnp.float32),
        "wk": scale * jax.random.normal(ks[1], (N_EMBD, NUM_HEADS * HEAD_SIZE), jnp.float32),
        "wv": scale * jax.random.normal(ks[2], (N_EMBD, NUM_HEADS * HEAD_SIZE), jnp.float32),
        "wproj": scale * jax.random.normal(ks[3], (NUM_HEADS * HEAD_SIZE, N_EMBD), jnp.float32),
        "bproj": jnp.zeros((1, N_EMBD), jnp.float32),
        "ln2_g": jnp.ones((1, N_EMBD), jnp.float32),
        "ln2_b": jnp.zeros((1, N_EMBD), jnp.float32),
        "w1": scale * jax.random.normal(ks[4], (N_EMBD, 4 * N_EMBD), jnp.float32),
        "b1": jnp.zeros((1, 4 * N_EMBD), jnp.float32),
        "w2": scale * jax.random.normal(ks[5], (4 * N_EMBD, N_EMBD), jnp.float32),
        "b2": jnp.zeros((1, N_EMBD), jnp.float32),
    }


def reference_forward(x, p):
    # Pure-JAX reference mirroring the PyTorch module (eval mode).
    def ln(z, g, b):
        mu = jnp.mean(z, axis=-1, keepdims=True)
        var = jnp.mean((z - mu) ** 2, axis=-1, keepdims=True)
        return (z - mu) / jnp.sqrt(var + LN_EPS) * g[0] + b[0]

    B, T, C = x.shape
    h = ln(x, p["ln1_g"], p["ln1_b"])
    q = h @ p["wq"]; k = h @ p["wk"]; v = h @ p["wv"]
    mask = jnp.tril(jnp.ones((T, T), bool))
    outs = []
    for hh in range(NUM_HEADS):
        sl = slice(hh * HEAD_SIZE, (hh + 1) * HEAD_SIZE)
        s = jnp.einsum("btd,bsd->bts", q[..., sl], k[..., sl]) / (C ** 0.5)
        s = jnp.where(mask, s, -jnp.inf)
        pr = jax.nn.softmax(s, axis=-1)
        outs.append(jnp.einsum("bts,bsd->btd", pr, v[..., sl]))
    att = jnp.concatenate(outs, axis=-1) @ p["wproj"] + p["bproj"][0]
    x1 = x + att
    h2 = ln(x1, p["ln2_g"], p["ln2_b"])
    ff = jnp.maximum(h2 @ p["w1"] + p["b1"][0], 0.0) @ p["w2"] + p["b2"][0]
    return x1 + ff


if __name__ == "__main__":
    key = jax.random.PRNGKey(0)
    kx, kp = jax.random.split(key)
    B, T, C = 2, BLOCK_SIZE, N_EMBD
    x = jax.random.normal(kx, (B, T, C), jnp.float32)
    params = init_params(kp)

    # One-time packing (weights + constant masks) outside the per-call path.
    w_in, w2, const, head_mask = pack_params(params, B)

    out = transformer_forward(x, w_in, w2, const, head_mask)
    out = jax.block_until_ready(out)

    ref = reference_forward(x, params)
    np.testing.assert_allclose(np.asarray(out), np.asarray(ref), atol=1e-5, rtol=1e-5)
    print("KERNEL_OK")
</pallas_src>

<mosaic_0001>
module attributes {stable_mosaic.version = 11 : i64} {
  func.func @transformer_kernel(%arg0: memref<16x32xf32, #tpu.memory_space<vmem>>, %arg1: memref<32x256xf32, #tpu.memory_space<vmem>>, %arg2: memref<128x32xf32, #tpu.memory_space<vmem>>, %arg3: memref<24x128xf32, #tpu.memory_space<vmem>>, %arg4: memref<128x32xf32, #tpu.memory_space<vmem>>, %arg5: memref<4x128xf32, #tpu.memory_space<vmem>>) attributes {dimension_semantics = [], scalar_prefetch = 0 : i64, scratch_operands = 0 : i64, tpu.core_type = #tpu.core_type<tc>} {
    %c0 = arith.constant 0 : index
    %c0_0 = arith.constant 0 : index
    %0 = vector.load %arg0[%c0, %c0_0] : memref<16x32xf32, #tpu.memory_space<vmem>>, vector<16x32xf32>
    %c0_1 = arith.constant 0 : index
    %c0_2 = arith.constant 0 : index
    %1 = vector.load %arg1[%c0_1, %c0_2] : memref<32x256xf32, #tpu.memory_space<vmem>>, vector<32x256xf32>
    %c0_3 = arith.constant 0 : index
    %c0_4 = arith.constant 0 : index
    %2 = vector.load %arg2[%c0_3, %c0_4] : memref<128x32xf32, #tpu.memory_space<vmem>>, vector<128x32xf32>
    %3 = vector.extract_strided_slice %1 {offsets = [0, 0], sizes = [32, 96], strides = [1, 1]} : vector<32x256xf32> to vector<32x96xf32>
    %4 = vector.extract_strided_slice %1 {offsets = [0, 96], sizes = [32, 32], strides = [1, 1]} : vector<32x256xf32> to vector<32x32xf32>
    %5 = vector.extract_strided_slice %1 {offsets = [0, 128], sizes = [32, 128], strides = [1, 1]} : vector<32x256xf32> to vector<32x128xf32>
    %c0_5 = arith.constant 0 : index
    %c0_6 = arith.constant 0 : index
    %6 = vector.load %arg3[%c0_5, %c0_6] : memref<24x128xf32, #tpu.memory_space<vmem>>, vector<1x32xf32>
    %c1 = arith.constant 1 : index
    %c0_7 = arith.constant 0 : index
    %7 = vector.load %arg3[%c1, %c0_7] : memref<24x128xf32, #tpu.memory_space<vmem>>, vector<1x32xf32>
    %c2 = arith.constant 2 : index
    %c0_8 = arith.constant 0 : index
    %8 = vector.load %arg3[%c2, %c0_8] : memref<24x128xf32, #tpu.memory_space<vmem>>, vector<1x32xf32>
    %c3 = arith.constant 3 : index
    %c0_9 = arith.constant 0 : index
    %9 = vector.load %arg3[%c3, %c0_9] : memref<24x128xf32, #tpu.memory_space<vmem>>, vector<1x32xf32>
    %c4 = arith.constant 4 : index
    %c0_10 = arith.constant 0 : index
    %10 = vector.load %arg3[%c4, %c0_10] : memref<24x128xf32, #tpu.memory_space<vmem>>, vector<1x32xf32>
    %c5 = arith.constant 5 : index
    %c0_11 = arith.constant 0 : index
    %11 = vector.load %arg3[%c5, %c0_11] : memref<24x128xf32, #tpu.memory_space<vmem>>, vector<1x32xf32>
    %c6 = arith.constant 6 : index
    %c0_12 = arith.constant 0 : index
    %12 = vector.load %arg3[%c6, %c0_12] : memref<24x128xf32, #tpu.memory_space<vmem>>, vector<1x128xf32>
    %c8 = arith.constant 8 : index
    %c0_13 = arith.constant 0 : index
    %13 = vector.load %arg3[%c8, %c0_13] : memref<24x128xf32, #tpu.memory_space<vmem>>, vector<16x128xf32>
    %c0_14 = arith.constant 0 : index
    %c0_15 = arith.constant 0 : index
    %14 = vector.load %arg4[%c0_14, %c0_15] : memref<128x32xf32, #tpu.memory_space<vmem>>, vector<128x32xf32>
    %cst = arith.constant dense<0.000000e+00> : vector<16xf32>
    %15 = vector.multi_reduction <add>, %0, %cst [1] : vector<16x32xf32> to vector<16xf32>
    %16 = vector.shape_cast %15 : vector<16xf32> to vector<16x1xf32>
    %cst_16 = arith.constant 3.200000e+01 : f32
    %17 = vector.broadcast %cst_16 : f32 to vector<16x1xf32>
    %18 = arith.divf %16, %17 : vector<16x1xf32>
    %19 = vector.broadcast %18 : vector<16x1xf32> to vector<16x32xf32>
    %20 = arith.subf %0, %19 : vector<16x32xf32>
    %21 = arith.mulf %20, %20 : vector<16x32xf32>
    %cst_17 = arith.constant dense<0.000000e+00> : vector<16xf32>
    %22 = vector.multi_reduction <add>, %21, %cst_17 [1] : vector<16x32xf32> to vector<16xf32>
    %23 = vector.shape_cast %22 : vector<16xf32> to vector<16x1xf32>
    %cst_18 = arith.constant 3.200000e+01 : f32
    %24 = vector.broadcast %cst_18 : f32 to vector<16x1xf32>
    %25 = arith.divf %23, %24 : vector<16x1xf32>
    %26 = vector.broadcast %18 : vector<16x1xf32> to vector<16x32xf32>
    %27 = arith.subf %0, %26 : vector<16x32xf32>
    %cst_19 = arith.constant 9.99999974E-6 : f32
    %28 = vector.broadcast %cst_19 : f32 to vector<16x1xf32>
    %29 = arith.addf %25, %28 : vector<16x1xf32>
    %30 = math.rsqrt %29 : vector<16x1xf32>
    %31 = vector.broadcast %30 : vector<16x1xf32> to vector<16x32xf32>
    %32 = arith.mulf %27, %31 : vector<16x32xf32>
    %33 = vector.broadcast %6 : vector<1x32xf32> to vector<16x32xf32>
    %34 = arith.mulf %32, %33 : vector<16x32xf32>
    %35 = vector.broadcast %7 : vector<1x32xf32> to vector<16x32xf32>
    %36 = arith.addf %34, %35 : vector<16x32xf32>
    %cst_20 = arith.constant dense<0.000000e+00> : vector<16x96xf32>
    %37 = tpu.matmul %36, %3, %cst_20 {dimension_numbers = #tpu.dot_dimension_numbers<[1], [0], [0], [1], [0, 0, 1, 1], [], []>} : vector<16x32xf32>, vector<32x96xf32>, vector<16x96xf32> -> vector<16x96xf32>
    %38 = vector.extract_strided_slice %37 {offsets = [0, 0], sizes = [16, 32], strides = [1, 1]} : vector<16x96xf32> to vector<16x32xf32>
    %39 = vector.extract_strided_slice %37 {offsets = [0, 32], sizes = [16, 32], strides = [1, 1]} : vector<16x96xf32> to vector<16x32xf32>
    %40 = vector.extract_strided_slice %37 {offsets = [0, 64], sizes = [16, 32], strides = [1, 1]} : vector<16x96xf32> to vector<16x32xf32>
    %41 = vector.shape_cast %38 : vector<16x32xf32> to vector<1x16x32xf32>
    %42 = vector.broadcast %41 : vector<1x16x32xf32> to vector<8x16x32xf32>
    %43 = vector.shape_cast %42 : vector<8x16x32xf32> to vector<128x32xf32>
    %44 = arith.mulf %43, %14 : vector<128x32xf32>
    %cst_21 = arith.constant dense<0.000000e+00> : vector<16x128xf32>
    %45 = tpu.matmul %39, %44, %cst_21 {dimension_numbers = #tpu.dot_dimension_numbers<[1], [1], [0], [0], [0, 0, 1, 0], [], []>} : vector<16x32xf32>, vector<128x32xf32>, vector<16x128xf32> -> vector<16x128xf32>
    %cst_22 = arith.constant 0.176776692 : f32
    %46 = vector.broadcast %cst_22 : f32 to vector<16x128xf32>
    %47 = arith.mulf %45, %46 : vector<16x128xf32>
    %48 = arith.addf %47, %13 : vector<16x128xf32>
    %cst_23 = arith.constant dense<0xFF800000> : vector<128xf32>
    %49 = vector.multi_reduction <maximumf>, %48, %cst_23 [0] : vector<16x128xf32> to vector<128xf32>
    %50 = vector.shape_cast %49 : vector<128xf32> to vector<1x128xf32>
    %51 = vector.broadcast %50 : vector<1x128xf32> to vector<16x128xf32>
    %52 = arith.subf %48, %51 : vector<16x128xf32>
    %53 = math.exp %52 : vector<16x128xf32>
    %cst_24 = arith.constant dense<0.000000e+00> : vector<128xf32>
    %54 = vector.multi_reduction <add>, %53, %cst_24 [0] : vector<16x128xf32> to vector<128xf32>
    %55 = vector.shape_cast %54 : vector<128xf32> to vector<1x128xf32>
    %56 = tpu.reciprocal %55 : vector<1x128xf32> -> vector<1x128xf32>
    %57 = vector.broadcast %56 : vector<1x128xf32> to vector<16x128xf32>
    %58 = arith.mulf %53, %57 : vector<16x128xf32>
    %cst_25 = arith.constant dense<0.000000e+00> : vector<128x32xf32>
    %59 = tpu.matmul %58, %40, %cst_25 {dimension_numbers = #tpu.dot_dimension_numbers<[0], [0], [1], [1], [0, 1, 1, 1], [], []>} : vector<16x128xf32>, vector<16x32xf32>, vector<128x32xf32> -> vector<128x32xf32>
    %60 = arith.mulf %59, %14 : vector<128x32xf32>
    %61 = vector.extract_strided_slice %60 {offsets = [0, 0], sizes = [16, 32], strides = [1, 1]} : vector<128x32xf32> to vector<16x32xf32>
    %62 = vector.extract_strided_slice %60 {offsets = [16, 0], sizes = [16, 32], strides = [1, 1]} : vector<128x32xf32> to vector<16x32xf32>
    %63 = arith.addf %61, %62 : vector<16x32xf32>
    %64 = vector.extract_strided_slice %60 {offsets = [32, 0], sizes = [16, 32], strides = [1, 1]} : vector<128x32xf32> to vector<16x32xf32>
    %65 = arith.addf %63, %64 : vector<16x32xf32>
    %66 = vector.extract_strided_slice %60 {offsets = [48, 0], sizes = [16, 32], strides = [1, 1]} : vector<128x32xf32> to vector<16x32xf32>
    %67 = arith.addf %65, %66 : vector<16x32xf32>
    %68 = vector.extract_strided_slice %60 {offsets = [64, 0], sizes = [16, 32], strides = [1, 1]} : vector<128x32xf32> to vector<16x32xf32>
    %69 = arith.addf %67, %68 : vector<16x32xf32>
    %70 = vector.extract_strided_slice %60 {offsets = [80, 0], sizes = [16, 32], strides = [1, 1]} : vector<128x32xf32> to vector<16x32xf32>
    %71 = arith.addf %69, %70 : vector<16x32xf32>
    %72 = vector.extract_strided_slice %60 {offsets = [96, 0], sizes = [16, 32], strides = [1, 1]} : vector<128x32xf32> to vector<16x32xf32>
    %73 = arith.addf %71, %72 : vector<16x32xf32>
    %74 = vector.extract_strided_slice %60 {offsets = [112, 0], sizes = [16, 32], strides = [1, 1]} : vector<128x32xf32> to vector<16x32xf32>
    %75 = arith.addf %73, %74 : vector<16x32xf32>
    %cst_26 = arith.constant dense<0.000000e+00> : vector<16x32xf32>
    %76 = tpu.matmul %75, %4, %cst_26 {dimension_numbers = #tpu.dot_dimension_numbers<[1], [0], [0], [1], [0, 0, 1, 1], [], []>} : vector<16x32xf32>, vector<32x32xf32>, vector<16x32xf32> -> vector<16x32xf32>
    %77 = vector.broadcast %10 : vector<1x32xf32> to vector<16x32xf32>
    %78 = arith.addf %76, %77 : vector<16x32xf32>
    %79 = arith.addf %0, %78 : vector<16x32xf32>
    %cst_27 = arith.constant dense<0.000000e+00> : vector<16xf32>
    %80 = vector.multi_reduction <add>, %79, %cst_27 [1] : vector<16x32xf32> to vector<16xf32>
    %81 = vector.shape_cast %80 : vector<16xf32> to vector<16x1xf32>
    %cst_28 = arith.constant 3.200000e+01 : f32
    %82 = vector.broadcast %cst_28 : f32 to vector<16x1xf32>
    %83 = arith.divf %81, %82 : vector<16x1xf32>
    %84 = vector.broadcast %83 : vector<16x1xf32> to vector<16x32xf32>
    %85 = arith.subf %79, %84 : vector<16x32xf32>
    %86 = arith.mulf %85, %85 : vector<16x32xf32>
    %cst_29 = arith.constant dense<0.000000e+00> : vector<16xf32>
    %87 = vector.multi_reduction <add>, %86, %cst_29 [1] : vector<16x32xf32> to vector<16xf32>
    %88 = vector.shape_cast %87 : vector<16xf32> to vector<16x1xf32>
    %cst_30 = arith.constant 3.200000e+01 : f32
    %89 = vector.broadcast %cst_30 : f32 to vector<16x1xf32>
    %90 = arith.divf %88, %89 : vector<16x1xf32>
    %91 = vector.broadcast %83 : vector<16x1xf32> to vector<16x32xf32>
    %92 = arith.subf %79, %91 : vector<16x32xf32>
    %cst_31 = arith.constant 9.99999974E-6 : f32
    %93 = vector.broadcast %cst_31 : f32 to vector<16x1xf32>
    %94 = arith.addf %90, %93 : vector<16x1xf32>
    %95 = math.rsqrt %94 : vector<16x1xf32>
    %96 = vector.broadcast %95 : vector<16x1xf32> to vector<16x32xf32>
    %97 = arith.mulf %92, %96 : vector<16x32xf32>
    %98 = vector.broadcast %8 : vector<1x32xf32> to vector<16x32xf32>
    %99 = arith.mulf %97, %98 : vector<16x32xf32>
    %100 = vector.broadcast %9 : vector<1x32xf32> to vector<16x32xf32>
    %101 = arith.addf %99, %100 : vector<16x32xf32>
    %cst_32 = arith.constant dense<0.000000e+00> : vector<16x128xf32>
    %102 = tpu.matmul %101, %5, %cst_32 {dimension_numbers = #tpu.dot_dimension_numbers<[1], [0], [0], [1], [0, 0, 1, 1], [], []>} : vector<16x32xf32>, vector<32x128xf32>, vector<16x128xf32> -> vector<16x128xf32>
    %103 = vector.broadcast %12 : vector<1x128xf32> to vector<16x128xf32>
    %104 = arith.addf %102, %103 : vector<16x128xf32>
    %cst_33 = arith.constant 0.000000e+00 : f32
    %105 = vector.broadcast %cst_33 : f32 to vector<16x128xf32>
    %106 = arith.maximumf %104, %105 : vector<16x128xf32>
    %cst_34 = arith.constant dense<0.000000e+00> : vector<16x32xf32>
    %107 = tpu.matmul %106, %2, %cst_34 {dimension_numbers = #tpu.dot_dimension_numbers<[1], [0], [0], [1], [0, 0, 1, 1], [], []>} : vector<16x128xf32>, vector<128x32xf32>, vector<16x32xf32> -> vector<16x32xf32>
    %108 = vector.broadcast %11 : vector<1x32xf32> to vector<16x32xf32>
    %109 = arith.addf %107, %108 : vector<16x32xf32>
    %110 = arith.addf %79, %109 : vector<16x32xf32>
    %111 = vector.extract_strided_slice %110 {offsets = [0, 0], sizes = [4, 32], strides = [1, 1]} : vector<16x32xf32> to vector<4x32xf32>
    %112 = vector.extract_strided_slice %110 {offsets = [4, 0], sizes = [4, 32], strides = [1, 1]} : vector<16x32xf32> to vector<4x32xf32>
    %113 = vector.extract_strided_slice %110 {offsets = [8, 0], sizes = [4, 32], strides = [1, 1]} : vector<16x32xf32> to vector<4x32xf32>
    %114 = vector.extract_strided_slice %110 {offsets = [12, 0], sizes = [4, 32], strides = [1, 1]} : vector<16x32xf32> to vector<4x32xf32>
    %115 = tpu.concatenate %111, %112, %113, %114 in 1 : vector<4x32xf32>, vector<4x32xf32>, vector<4x32xf32>, vector<4x32xf32> -> vector<4x128xf32>
    %c0_35 = arith.constant 0 : index
    %c0_36 = arith.constant 0 : index
    %116 = vector.load %arg5[%c0_35, %c0_36] : memref<4x128xf32, #tpu.memory_space<vmem>>, vector<4x128xf32>
    tpu.vector_store %arg5[%c0_35, %c0_36], %115 {strides = array<i32>} : memref<4x128xf32, #tpu.memory_space<vmem>>, vector<4x128xf32>,
    return
  }
}

</mosaic_0001>

<bundles_post_ra>
// kernel: transformer_forward.1
= control target key start
LH: loop header
LB: loop body
LE: loop exit
PB: predicated region body
PF: predicated region fallthrough
CT: control target
= control target key end

     0   :  { %vm71_vm0 = vcmask 261120   ;;  %s1230_s12 = smov 96   ;;  %s1231_s15 = smov 64   ;;  %vm406_vm1 = vcmask 130048   ;;  %vm953_vm2 = vcmask 523264   ;;  %vm955_vm3 = vcmask 785408   ;;  %s1611_s0 = inlined_call_operand.vmem [shape: f32[16,32], index: 0, kind: input, shape index: {}]   ;;  %s1612_s1 = inlined_call_operand.vmem [shape: f32[32,256], index: 1, kind: input, shape index: {}]   ;;  %s1613_s3 = inlined_call_operand.vmem [shape: f32[24,128], index: 3, kind: input, shape index: {}]   ;;  %s1614_s4 = inlined_call_operand.vmem [shape: f32[128,32], index: 4, kind: input, shape index: {}]   ;;  %s1615_s2 = inlined_call_operand.vmem [shape: f32[128,32], index: 2, kind: input, shape index: {}]   ;;  %s1616_s5 = inlined_call_operand.vmem [shape: f32[4,128], index: 5, kind: output, shape index: {}]  }
   0x1   :  { %v1266_v0 = vld [vmem:[%s1611_s0] sm:$0xff]  ;;  %v1271_v1 = vld [vmem:[%s1611_s0 + $0x8] sm:$0xff]  ;;  %v1284_v14 = vld [vmem:[%s1612_s1 + $0x30] sm:$0xff]  ;;  %s1232_s21 = smov 32  }
   0x2   :  { %v72_v2 = vsel %vm71_vm0, %v1266_v0, 0.0  ;;  %v75_v3 = vsel %vm71_vm0, %v1271_v1, 0.0  ;;  %v1289_v15 = vld [vmem:[%s1612_s1 + $0x20] sm:$0xff]  ;;  %1081 = vmatprep.subr.mxu1 %v1284_v14  ;;  %v1296_v16 = vld [vmem:[%s1612_s1 + $0x10] sm:$0xff]  ;;  %v1320_v34 = vld [vmem:[%s1614_s4 + $0x78] sm:$0xff] }
   0x3   :  { %73 = vadd.xlane.f32.xlu0 %v72_v2  ;;  %1082 = vmatpush3.msra.mxu1 %v1284_v14  ;;  %v1305_v17 = vld [vmem:[%s1612_s1] sm:$0xff]  ;;  %v1327_v36 = vld [vmem:[%s1614_s4 + $0x70] sm:$0xff]  ;;  %v1340_v40 = vld [vmem:[%s1614_s4 + $0x68] sm:$0xff] }
   0x4   :  { %1083 = vmatprep.subr.mxu1 %v1289_v15  ;;  %v962_v25 = vld [vmem:[%s1613_s3] ss:$0 sm:$0xff]  ;;  %v963_v27 = vld [vmem:[%s1613_s3 + $0x1] ss:$0 sm:$0xff]  ;;  %v1360_v44 = vld [vmem:[%s1614_s4 + $0x58] sm:$0xff] }
   0x5   :  { %1084 = vmatpush3.msra.mxu1 %v1289_v15  ;;  %v1351_v42 = vld [vmem:[%s1614_s4 + $0x60] sm:$0xff]  ;;  %v1369_v46 = vld [vmem:[%s1614_s4 + $0x50] sm:$0xff]  ;;  %v1377_v48 = vld [vmem:[%s1614_s4 + $0x48] sm:$0xff] }
   0x6   :  { %1085 = vmatprep.subr.mxu1 %v1296_v16  ;;  %v1386_v50 = vld [vmem:[%s1614_s4 + $0x40] sm:$0xff]  ;;  %v1394_v52 = vld [vmem:[%s1614_s4 + $0x38] sm:$0xff]  ;;  %v1403_v54 = vld [vmem:[%s1614_s4 + $0x30] sm:$0xff] }
   0x7   :  { %76 = vadd.xlane.f32.xlu0 %v75_v3  ;;  %1086 = vmatpush3.msra.mxu1 %v1296_v16  ;;  %v1411_v56 = vld [vmem:[%s1614_s4 + $0x28] sm:$0xff]  ;;  %v1420_v58 = vld [vmem:[%s1614_s4 + $0x20] sm:$0xff]  ;;  %v1428_v60 = vld [vmem:[%s1614_s4 + $0x18] sm:$0xff] }
   0x8   :  { %1087 = vmatprep.subr.mxu1 %v1305_v17  ;;  %v1437_v62 = vld [vmem:[%s1614_s4 + $0x10] sm:$0xff]  ;;  %v1445_v2 = vld [vmem:[%s1614_s4 + $0x8] sm:$0xff] }
   0x9   :  { %1088 = vmatpush3.msra.mxu1 %v1305_v17 }
  0x8c   :  { %v74_v4 = vpop.xlane.xlu0 %73 }
  0x8d   :  { %v79_v5 = vmul.f32 0.03125, %v74_v4  ;;  %v1454_v4 = vld [vmem:[%s1614_s4] sm:$0xff] }
  0x8f   :  { %v81_v6 = vsub.f32 %v1266_v0, %v79_v5 }
  0x90   :  { %v77_v7 = vpop.xlane.xlu0 %76 }
  0x91   :  { %v80_v8 = vmul.f32 0.03125, %v77_v7  ;;  %v83_v9 = vmul.f32 %v81_v6, %v81_v6 }
  0x93   :  { %v82_v10 = vsub.f32 %v1271_v1, %v80_v8  ;;  %v85_v11 = vsel %vm71_vm0, %v83_v9, 0.0 }
  0x94   :  { %86 = vadd.xlane.f32.xlu1 %v85_v11 }
  0x95   :  { %v84_v12 = vmul.f32 %v82_v10, %v82_v10 }
  0x97   :  { %v88_v13 = vsel %vm71_vm0, %v84_v12, 0.0  ;;  %v54_v12 = vld [vmem:[%s1613_s3 + $0x10] sm:$0xff] }
  0x98   :  { %89 = vadd.xlane.f32.xlu1 %v88_v13  ;;  %v53_v13 = vld [vmem:[%s1613_s3 + $0x8] sm:$0xff] }
 0x11d   :  { %v87_v18 = vpop.xlane.xlu1 %86 }
 0x11e   :  { %v91_v19 = vmul.f32 0.03125, %v87_v18 }
 0x120   :  { %v93_v20 = vadd.f32 1e-05, %v91_v19 }
 0x121   :  { %v90_v21 = vpop.xlane.xlu1 %89 }
 0x122   :  { %1216 = vrsqrt.f32 %v93_v20  ;;  %v92_v22 = vmul.f32 0.03125, %v90_v21 }
 0x124   :  { %v94_v23 = vadd.f32 1e-05, %v92_v22 }
 0x126   :  { %1218 = vrsqrt.f32 %v94_v23 }
 0x12f   :  { %v1217_v24 = vpop.eup %1216 }
 0x130   :  { %v97_v26 = vmul.f32 %v1217_v24, %v81_v6 }
 0x132   :  { %v103_v28 = vmul.f32 %v962_v25, %v97_v26 }
 0x133   :  { %v1219_v29 = vpop.eup %1218 }
 0x134   :  { %v98_v30 = vmul.f32 %v1219_v29, %v82_v10  ;;  %v109_v31 = vadd.f32 %v963_v27, %v103_v28 }
 0x136   :  { %v104_v32 = vmul.f32 %v962_v25, %v98_v30  ;;  %1089 = vmatprep.mubr.msk.f32.mxu1 %vm71_vm0, %v109_v31 }
 0x138   :  { %v110_v33 = vadd.f32 %v963_v27, %v104_v32 }
 0x13a   :  { %1090 = vmatmul.mubr.msk.f32.vlgmr.msra.gmra.mxu1 %vm71_vm0, %v110_v33 }
 0x1fa   :  { %v1322_v35 = vpop.f32.mrf.mxu1 }
 0x1fb   :  { %212 = vrot.lane.b32.xlu1 %v1322_v35, %s1230_s12  ;;  %v207_v37 = vmul.f32 %v1322_v35, %v1320_v34  ;;  %v205_v41 = vmul.f32 %v1322_v35, %v1340_v40  ;;  %v203_v45 = vmul.f32 %v1322_v35, %v1360_v44  ;;  %v201_v49 = vmul.f32 %v1322_v35, %v1377_v48 }
 0x1fc   :  { %v183_v38 = vpop.f32.mrf.mxu1  ;;  %v199_v53 = vmul.f32 %v1322_v35, %v1394_v52  ;;  %v197_v57 = vmul.f32 %v1322_v35, %v1411_v56  ;;  %v195_v61 = vmul.f32 %v1322_v35, %v1428_v60  ;;  %v193_v3 = vmul.f32 %v1322_v35, %v1445_v2 }
 0x1fd   :  { %1092 = vmatprep.subr.msk.mxu1 %vm71_vm0, %v207_v37  ;;  %210 = vrot.lane.b32.xlu0 %v183_v38, %s1230_s12  ;;  %v206_v39 = vmul.f32 %v183_v38, %v1327_v36  ;;  %v204_v43 = vmul.f32 %v183_v38, %v1351_v42  ;;  %v202_v47 = vmul.f32 %v183_v38, %v1369_v46 }
 0x1fe   :  { %1093 = vmatpush3.xpose.msk.msra.mxu1 %vm71_vm0, %v207_v37  ;;  %v200_v51 = vmul.f32 %v183_v38, %v1386_v50  ;;  %v198_v55 = vmul.f32 %v183_v38, %v1403_v54  ;;  %v196_v59 = vmul.f32 %v183_v38, %v1420_v58  ;;  %v194_v63 = vmul.f32 %v183_v38, %v1437_v62 }
 0x1ff   :  { %402 = vrot.lane.b32.xlu1 %v1322_v35, %s1231_s15  ;;  %1094 = vmatprep.subr.msk.mxu1 %vm71_vm0, %v206_v39  ;;  %v192_v5 = vmul.f32 %v183_v38, %v1454_v4 }
 0x202   :  { %1095 = vmatpush3.xpose.msk.msra.mxu1 %vm71_vm0, %v206_v39 }
 0x203   :  { %400 = vrot.lane.b32.xlu1 %v183_v38, %s1231_s15  ;;  %1096 = vmatprep.subr.msk.mxu1 %vm71_vm0, %v205_v41 }
 0x206   :  { %1097 = vmatpush3.xpose.msk.msra.mxu1 %vm71_vm0, %v205_v41 }
 0x207   :  { %1098 = vmatprep.subr.msk.mxu1 %vm71_vm0, %v204_v43  ;;  %644 = vrot.lane.b32.xlu1 %v1284_v14, %s1232_s21 }
 0x20a   :  { %1099 = vmatpush3.xpose.msk.msra.mxu1 %vm71_vm0, %v204_v43 }
 0x20b   :  { %1100 = vmatprep.subr.msk.mxu1 %vm71_vm0, %v203_v45  ;;  %642 = vrot.lane.b32.xlu1 %v1289_v15, %s1232_s21 }
 0x20e   :  { %1101 = vmatpush3.xpose.msk.msra.mxu1 %vm71_vm0, %v203_v45 }
 0x20f   :  { %1102 = vmatprep.subr.msk.mxu1 %vm71_vm0, %v202_v47  ;;  %640 = vrot.lane.b32.xlu1 %v1296_v16, %s1232_s21 }
 0x212   :  { %1103 = vmatpush3.xpose.msk.msra.mxu1 %vm71_vm0, %v202_v47 }
 0x213   :  { %1104 = vmatprep.subr.msk.mxu1 %vm71_vm0, %v201_v49  ;;  %638 = vrot.lane.b32.xlu1 %v1305_v17, %s1232_s21 }
 0x216   :  { %1105 = vmatpush3.xpose.msk.msra.mxu1 %vm71_vm0, %v201_v49 }
 0x217   :  { %1106 = vmatprep.subr.msk.mxu1 %vm71_vm0, %v200_v51 }
 0x21a   :  { %1107 = vmatpush3.xpose.msk.msra.mxu1 %vm71_vm0, %v200_v51 }
 0x21b   :  { %1108 = vmatprep.subr.msk.mxu1 %vm71_vm0, %v199_v53 }
 0x21e   :  { %1109 = vmatpush3.xpose.msk.msra.mxu1 %vm71_vm0, %v199_v53 }
 0x21f   :  { %1110 = vmatprep.subr.msk.mxu1 %vm71_vm0, %v198_v55 }
 0x222   :  { %1111 = vmatpush3.xpose.msk.msra.mxu1 %vm71_vm0, %v198_v55 }
 0x223   :  { %1112 = vmatprep.subr.msk.mxu1 %vm71_vm0, %v197_v57 }
 0x226   :  { %1113 = vmatpush3.xpose.msk.msra.mxu1 %vm71_vm0, %v197_v57 }
 0x227   :  { %1114 = vmatprep.subr.msk.mxu1 %vm71_vm0, %v196_v59 }
 0x22a   :  { %1115 = vmatpush3.xpose.msk.msra.mxu1 %vm71_vm0, %v196_v59 }
 0x22b   :  { %1116 = vmatprep.subr.msk.mxu1 %vm71_vm0, %v195_v61 }
 0x22e   :  { %1117 = vmatpush3.xpose.msk.msra.mxu1 %vm71_vm0, %v195_v61 }
 0x22f   :  { %1118 = vmatprep.subr.msk.mxu1 %vm71_vm0, %v194_v63 }
 0x232   :  { %1119 = vmatpush3.xpose.msk.msra.mxu1 %vm71_vm0, %v194_v63 }
 0x233   :  { %1120 = vmatprep.subr.msk.mxu1 %vm71_vm0, %v193_v3 }
 0x236   :  { %1121 = vmatpush3.xpose.msk.msra.mxu1 %vm71_vm0, %v193_v3 }
 0x237   :  { %1122 = vmatprep.subr.msk.mxu1 %vm71_vm0, %v192_v5 }
 0x23a   :  { %1123 = vmatpush3.xpose.msk.msra.mxu1 %vm71_vm0, %v192_v5 }
 0x26d   :  { %v213_v6 = vpop.permute.xlu1 %212 }
 0x26f   :  { %v211_v7 = vpop.permute.xlu0 %210 }
 0x270   :  { %1124 = vmatprep.mubr.msk.f32.mxu1 %vm71_vm0, %v211_v7 }
 0x271   :  { %v403_v8 = vpop.permute.xlu1 %402  ;;  %1125 = vmatmul.mubr.msk.f32.vlgmr.msra.gmra.mxu1 %vm71_vm0, %v213_v6 }
 0x272   :  { %1127 = vmatprep.subr.mxu0 %v403_v8 }
 0x273   :  { %1128 = vmatpush3.msra.mxu0 %v403_v8 }
 0x275   :  { %v401_v9 = vpop.permute.xlu1 %400 }
 0x276   :  { %1129 = vmatprep.subr.mxu0 %v401_v9 }
 0x277   :  { %1130 = vmatpush3.msra.mxu0 %v401_v9 }
 0x331   :  { %v1126_v10 = vpop.f32.mrf.mxu1 }
 0x332   :  { %v342_v11 = vmul.f32 0.17677669, %v1126_v10 }
 0x333   :  { %v332_v18 = vpop.f32.mrf.mxu1 }
 0x334   :  { %v341_v19 = vmul.f32 0.17677669, %v332_v18  ;;  %v344_v20 = vadd.f32 %v342_v11, %v54_v12  ;;  %v645_v11 = vpop.permute.xlu1 %644 }
 0x335   :  { %1155 = vmatprep.subr.mxu0 %v645_v11 }
 0x336   :  { %v343_v21 = vadd.f32 %v341_v19, %v53_v13 }
 0x338   :  { %v345_v22 = vmax.f32 %v343_v21, %v344_v20  ;;  %v643_v12 = vpop.permute.xlu1 %642 }
 0x33a   :  { %v346_v23 = vrot.slane %v345_v22, 4 }
 0x33c   :  { %v347_v24 = vmax.f32 %v345_v22, %v346_v23  ;;  %v641_v13 = vpop.permute.xlu1 %640 }
 0x33e   :  { %v348_v25 = vrot.slane %v347_v24, 2 }
 0x340   :  { %v349_v26 = vmax.f32 %v347_v24, %v348_v25  ;;  %v639_v18 = vpop.permute.xlu1 %638 }
 0x342   :  { %v350_v27 = vrot.slane %v349_v26, 1 }
 0x344   :  { %v351_v28 = vmax.f32 %v349_v26, %v350_v27 }
 0x346   :  { %v352_v29 = vsub.f32 %v343_v21, %v351_v28  ;;  %v353_v30 = vsub.f32 %v344_v20, %v351_v28 }
 0x348   :  { %v354_v31 = vmul.f32 1.442695, %v352_v29  ;;  %v356_v32 = vmul.f32 1.442695, %v353_v30 }
 0x34a   :  { %1220 = vpow2.f32 %v354_v31 }
 0x34b   :  { %1222 = vpow2.f32 %v356_v32 }
 0x357   :  { %v1221_v33 = vpop.eup %1220 }
 0x358   :  { %v1223_v35 = vpop.eup %1222 }
 0x359   :  { %v358_v37 = vadd.f32 %v1223_v35, %v1221_v33 }
 0x35b   :  { %v359_v38 = vrot.slane %v358_v37, 4 }
 0x35d   :  { %v360_v39 = vadd.f32 %v359_v38, %v358_v37 }
 0x35f   :  { %v361_v41 = vrot.slane %v360_v39, 2 }
 0x361   :  { %v362_v43 = vadd.f32 %v361_v41, %v360_v39 }
 0x363   :  { %v363_v45 = vrot.slane %v362_v43, 1 }
 0x365   :  { %v364_v47 = vadd.f32 %v363_v45, %v362_v43 }
 0x367   :  { %1224 = vrcp.f32 %v364_v47 }
 0x374   :  { %v1225_v49 = vpop.eup %1224 }
 0x375   :  { %v366_v51 = vmul.f32 %v1225_v49, %v1221_v33  ;;  %v367_v53 = vmul.f32 %v1225_v49, %v1223_v35 }
 0x377   :  { %368 = vxpose.xlu0.b32.start [1/2] (short) %v366_v51, 128 }
 0x37b   :  { %369 = vxpose.xlu0.b32.end [2/2] (short) %v367_v53, 128 }
 0x3f3   :  { %v384_v55 = vpop.trf.xlu0 }
 0x3f4   :  { %1131 = vmatprep.mubr.msk.f32.mxu0 %vm406_vm1, %v384_v55 }
 0x3f7   :  { %v385_v57 = vpop.trf.xlu0 }
 0x3f8   :  { %1132 = vmatmul.mubr.msk.f32.vlgmr.msra.gmra.mxu0 %vm406_vm1, %v385_v57 }
 0x3f9   :  { %1156 = vmatpush3.msra.mxu0 %v645_v11 }
 0x3fa   :  { %1157 = vmatprep.subr.mxu0 %v643_v12 }
 0x3fb   :  { %v386_v59 = vpop.trf.xlu0  ;;  %1158 = vmatpush3.msra.mxu0 %v643_v12 }
 0x3fc   :  { %1134 = vmatprep.mubr.msk.f32.mxu0 %vm406_vm1, %v386_v59  ;;  %1159 = vmatprep.subr.mxu0 %v641_v13 }
 0x3fd   :  { %1160 = vmatpush3.msra.mxu0 %v641_v13 }
 0x3fe   :  { %1161 = vmatprep.subr.mxu0 %v639_v18 }
 0x3ff   :  { %v387_v14 = vpop.trf.xlu0  ;;  %1162 = vmatpush3.msra.mxu0 %v639_v18 }
 0x400   :  { %1135 = vmatmul.mubr.msk.f32.gmra.mxu0 %vm406_vm1, %v387_v14 }
 0x403   :  { %v388_v15 = vpop.trf.xlu0 }
 0x404   :  { %1137 = vmatprep.mubr.msk.f32.mxu0 %vm406_vm1, %v388_v15 }
 0x407   :  { %v389_v16 = vpop.trf.xlu0 }
 0x408   :  { %1138 = vmatmul.mubr.msk.f32.gmra.mxu0 %vm406_vm1, %v389_v16 }
 0x40b   :  { %v390_v17 = vpop.trf.xlu0 }
 0x40c   :  { %1140 = vmatprep.mubr.msk.f32.mxu0 %vm406_vm1, %v390_v17 }
 0x40f   :  { %v391_v61 = vpop.trf.xlu0 }
 0x410   :  { %1141 = vmatmul.mubr.msk.f32.gmra.mxu0 %vm406_vm1, %v391_v61 }
 0x413   :  { %v392_v63 = vpop.trf.xlu0 }
 0x414   :  { %1143 = vmatprep.mubr.msk.f32.mxu0 %vm406_vm1, %v392_v63 }
 0x417   :  { %v393_v3 = vpop.trf.xlu0 }
 0x418   :  { %1144 = vmatmul.mubr.msk.f32.gmra.mxu0 %vm406_vm1, %v393_v3 }
 0x41b   :  { %v394_v5 = vpop.trf.xlu0 }
 0x41c   :  { %1146 = vmatprep.mubr.msk.f32.mxu0 %vm406_vm1, %v394_v5 }
 0x41f   :  { %v395_v6 = vpop.trf.xlu0 }
 0x420   :  { %1147 = vmatmul.mubr.msk.f32.gmra.mxu0 %vm406_vm1, %v395_v6 }
 0x423   :  { %v396_v7 = vpop.trf.xlu0 }
 0x424   :  { %1149 = vmatprep.mubr.msk.f32.mxu0 %vm406_vm1, %v396_v7 }
 0x427   :  { %v397_v8 = vpop.trf.xlu0 }
 0x428   :  { %1150 = vmatmul.mubr.msk.f32.gmra.mxu0 %vm406_vm1, %v397_v8 }
 0x42b   :  { %v398_v9 = vpop.trf.xlu0 }
 0x42c   :  { %1152 = vmatprep.mubr.msk.f32.mxu0 %vm406_vm1, %v398_v9 }
 0x42f   :  { %v399_v10 = vpop.trf.xlu0 }
 0x430   :  { %1153 = vmatmul.mubr.msk.f32.gmra.mxu0 %vm406_vm1, %v399_v10 }
 0x4b8   :  { %v1133_v19 = vpop.f32.mrf.mxu0 }
 0x4b9   :  { %v601_v37 = vmul.f32 %v1133_v19, %v1445_v2 }
 0x4ba   :  { %v521_v20 = vpop.f32.mrf.mxu0 }
 0x4bb   :  { %v600_v33 = vmul.f32 %v521_v20, %v1454_v4  ;;  %v29_v20 = vld [vmem:[%s1612_s1 + $0x38] sm:$0xff] }
 0x4bc   :  { %1166 = vmatprep.subr.mxu0 %v29_v20 }
 0x4c0   :  { %v1136_v21 = vpop.f32.mrf.mxu0 }
 0x4c1   :  { %v603_v31 = vmul.f32 %v1136_v21, %v1428_v60  ;;  %v27_v21 = vld [vmem:[%s1612_s1 + $0x28] sm:$0xff] }
 0x4c2   :  { %v531_v22 = vpop.f32.mrf.mxu0 }
 0x4c3   :  { %v602_v30 = vmul.f32 %v531_v22, %v1437_v62  ;;  %v617_v45 = vadd.f32 %v603_v31, %v601_v37  ;;  %v25_v22 = vld [vmem:[%s1612_s1 + $0x18] sm:$0xff] }
 0x4c5   :  { %v616_v41 = vadd.f32 %v602_v30, %v600_v33 }
 0x4c8   :  { %v1139_v23 = vpop.f32.mrf.mxu0 }
 0x4c9   :  { %v605_v38 = vmul.f32 %v1139_v23, %v1411_v56  ;;  %v23_v23 = vld [vmem:[%s1612_s1 + $0x8] sm:$0xff] }
 0x4ca   :  { %v541_v24 = vpop.f32.mrf.mxu0 }
 0x4cb   :  { %v604_v35 = vmul.f32 %v541_v24, %v1420_v58  ;;  %v619_v60 = vadd.f32 %v617_v45, %v605_v38  ;;  %v45_v24 = vld [vmem:[%s1615_s2 + $0x78] sm:$0xff] }
 0x4cd   :  { %v618_v49 = vadd.f32 %v616_v41, %v604_v35  ;;  %v1004_v35 = vld [vmem:[%s1613_s3 + $0x3] ss:$0 sm:$0xff] }
 0x4d0   :  { %v1142_v25 = vpop.f32.mrf.mxu0 }
 0x4d1   :  { %v607_v47 = vmul.f32 %v1142_v25, %v1394_v52 }
 0x4d2   :  { %v551_v26 = vpop.f32.mrf.mxu0 }
 0x4d3   :  { %v606_v43 = vmul.f32 %v551_v26, %v1403_v54  ;;  %v621_v2 = vadd.f32 %v619_v60, %v607_v47  ;;  %v44_v47 = vld [vmem:[%s1615_s2 + $0x70] sm:$0xff]  ;;  %v41_v60 = vld [vmem:[%s1615_s2 + $0x58] sm:$0xff] }
 0x4d5   :  { %v620_v53 = vadd.f32 %v618_v49, %v606_v43  ;;  %v43_v49 = vld [vmem:[%s1615_s2 + $0x68] sm:$0xff] }
 0x4d8   :  { %v1145_v27 = vpop.f32.mrf.mxu0 }
 0x4d9   :  { %v609_v51 = vmul.f32 %v1145_v27, %v1377_v48 }
 0x4da   :  { %v561_v28 = vpop.f32.mrf.mxu0 }
 0x4db   :  { %v608_v62 = vmul.f32 %v561_v28, %v1386_v50  ;;  %v623_v54 = vadd.f32 %v621_v2, %v609_v51  ;;  %v40_v51 = vld [vmem:[%s1615_s2 + $0x50] sm:$0xff] }
 0x4dc   :  { %v36_v2 = vld [vmem:[%s1615_s2 + $0x30] sm:$0xff] }
 0x4dd   :  { %v622_v55 = vadd.f32 %v620_v53, %v608_v62  ;;  %v42_v62 = vld [vmem:[%s1615_s2 + $0x60] sm:$0xff] }
 0x4de   :  { %v38_v53 = vld [vmem:[%s1615_s2 + $0x40] sm:$0xff] }
 0x4e0   :  { %v1148_v29 = vpop.f32.mrf.mxu0 }
 0x4e1   :  { %v611_v56 = vmul.f32 %v1148_v29, %v1360_v44 }
 0x4e2   :  { %v571_v32 = vpop.f32.mrf.mxu0 }
 0x4e3   :  { %v610_v58 = vmul.f32 %v571_v32, %v1369_v46  ;;  %v625_v15 = vadd.f32 %v623_v54, %v611_v56  ;;  %v1003_v32 = vld [vmem:[%s1613_s3 + $0x2] ss:$0 sm:$0xff]  ;;  %v35_v56 = vld [vmem:[%s1615_s2 + $0x28] sm:$0xff]  ;;  %v32_v54 = vld [vmem:[%s1615_s2 + $0x10] sm:$0xff] }
 0x4e5   :  { %v624_v14 = vadd.f32 %v622_v55, %v610_v58  ;;  %v37_v58 = vld [vmem:[%s1615_s2 + $0x38] sm:$0xff]  ;;  %v34_v55 = vld [vmem:[%s1615_s2 + $0x20] sm:$0xff] }
 0x4e8   :  { %v1151_v39 = vpop.f32.mrf.mxu0 }
 0x4e9   :  { %v613_v59 = vmul.f32 %v1151_v39, %v1340_v40  ;;  %v1000_v40 = vld [vmem:[%s1613_s3 + $0x4] ss:$0 sm:$0xff] }
 0x4ea   :  { %v581_v4 = vpop.f32.mrf.mxu0 }
 0x4eb   :  { %v612_v57 = vmul.f32 %v581_v4, %v1351_v42  ;;  %v627_v61 = vadd.f32 %v625_v15, %v613_v59  ;;  %v39_v4 = vld [vmem:[%s1615_s2 + $0x48] sm:$0xff] }
 0x4ec   :  { %v31_v59 = vld [vmem:[%s1615_s2 + $0x8] sm:$0xff] }
 0x4ed   :  { %v626_v48 = vadd.f32 %v624_v14, %v612_v57  ;;  %v33_v57 = vld [vmem:[%s1615_s2 + $0x18] sm:$0xff]  ;;  %v1005_v14 = vld [vmem:[%s1613_s3 + $0x6] ss:$0 sm:$0xff] }
 0x4f0   :  { %v1154_v52 = vpop.f32.mrf.mxu0 }
 0x4f1   :  { %v615_v50 = vmul.f32 %v1154_v52, %v1320_v34  ;;  %v30_v52 = vld [vmem:[%s1615_s2] sm:$0xff] }
 0x4f2   :  { %v591_v16 = vpop.f32.mrf.mxu0 }
 0x4f3   :  { %v614_v17 = vmul.f32 %v591_v16, %v1327_v36  ;;  %v629_v63 = vadd.f32 %v627_v61, %v615_v50 }
 0x4f5   :  { %v628_v46 = vadd.f32 %v626_v48, %v614_v17 }
 0x4f7   :  { %1163 = vmatprep.mubr.msk.f32.mxu0 %vm71_vm0, %v628_v46  ;;  %v1008_v46 = vld [vmem:[%s1613_s3 + $0x5] ss:$0 sm:$0xff] }
 0x4f8   :  { %1164 = vmatmul.mubr.msk.f32.vlgmr.msra.gmra.mxu0 %vm71_vm0, %v629_v63 }
 0x4f9   :  { %1167 = vmatpush3.msra.mxu0 %v29_v20 }
 0x4fa   :  { %1168 = vmatprep.subr.mxu0 %v27_v21 }
 0x4fb   :  { %1169 = vmatpush3.msra.mxu0 %v27_v21 }
 0x4fc   :  { %1170 = vmatprep.subr.mxu0 %v25_v22 }
 0x4fd   :  { %1171 = vmatpush3.msra.mxu0 %v25_v22 }
 0x4fe   :  { %1172 = vmatprep.subr.mxu0 %v23_v23 }
 0x4ff   :  { %1173 = vmatpush3.msra.mxu0 %v23_v23 }
 0x500   :  { %1177 = vmatprep.subr.mxu0 %v45_v24 }
 0x5b8   :  { %v1165_v42 = vpop.f32.mrf.mxu0 }
 0x5b9   :  { %v728_v44 = vadd.f32 %v1165_v42, %v1000_v40 }
 0x5ba   :  { %v722_v3 = vpop.f32.mrf.mxu0 }
 0x5bb   :  { %v1515_v34 = vadd.f32 %v728_v44, %v1271_v1  ;;  %v723_v5 = vadd.f32 %v1000_v40, %v722_v3 }
 0x5bd   :  { %v1518_v36 = vadd.f32 %v723_v5, %v1266_v0  ;;  %v736_v6 = vsel %vm71_vm0, %v1515_v34, 0.0 }
 0x5be   :  { %737 = vadd.xlane.f32.xlu0 %v736_v6 }
 0x5bf   :  { %v733_v7 = vsel %vm71_vm0, %v1518_v36, 0.0 }
 0x5c0   :  { %734 = vadd.xlane.f32.xlu1 %v733_v7 }
 0x647   :  { %v738_v8 = vpop.xlane.xlu0 %737 }
 0x648   :  { %v740_v9 = vmul.f32 0.03125, %v738_v8 }
 0x649   :  { %v735_v10 = vpop.xlane.xlu1 %734 }
 0x64a   :  { %v739_v11 = vmul.f32 0.03125, %v735_v10  ;;  %v742_v12 = vsub.f32 %v1515_v34, %v740_v9 }
 0x64c   :  { %v741_v1 = vsub.f32 %v1518_v36, %v739_v11  ;;  %v744_v18 = vmul.f32 %v742_v12, %v742_v12 }
 0x64e   :  { %v743_v13 = vmul.f32 %v741_v1, %v741_v1  ;;  %v748_v19 = vsel %vm71_vm0, %v744_v18, 0.0 }
 0x650   :  { %v745_v0 = vsel %vm71_vm0, %v743_v13, 0.0 }
 0x651   :  { %746 = vadd.xlane.f32.xlu1 %v745_v0 }
 0x655   :  { %749 = vadd.xlane.f32.xlu1 %v748_v19 }
 0x6da   :  { %v747_v25 = vpop.xlane.xlu1 %746 }
 0x6db   :  { %v751_v26 = vmul.f32 0.03125, %v747_v25 }
 0x6dd   :  { %v753_v27 = vadd.f32 1e-05, %v751_v26 }
 0x6de   :  { %v750_v28 = vpop.xlane.xlu1 %749 }
 0x6df   :  { %1226 = vrsqrt.f32 %v753_v27  ;;  %v752_v29 = vmul.f32 0.03125, %v750_v28 }
 0x6e1   :  { %v754_v30 = vadd.f32 1e-05, %v752_v29 }
 0x6e3   :  { %1228 = vrsqrt.f32 %v754_v30 }
 0x6ec   :  { %v1227_v31 = vpop.eup %1226 }
 0x6ed   :  { %v757_v33 = vmul.f32 %v1227_v31, %v741_v1 }
 0x6ef   :  { %v763_v37 = vmul.f32 %v1003_v32, %v757_v33 }
 0x6f0   :  { %v1229_v38 = vpop.eup %1228 }
 0x6f1   :  { %v758_v39 = vmul.f32 %v1229_v38, %v742_v12  ;;  %v769_v41 = vadd.f32 %v1004_v35, %v763_v37 }
 0x6f3   :  { %v764_v43 = vmul.f32 %v1003_v32, %v758_v39  ;;  %1174 = vmatprep.mubr.msk.f32.mxu0 %vm71_vm0, %v769_v41 }
 0x6f5   :  { %v770_v45 = vadd.f32 %v1004_v35, %v764_v43 }
 0x6f7   :  { %1175 = vmatmul.mubr.msk.f32.vlgmr.msra.gmra.mxu0 %vm71_vm0, %v770_v45 }
 0x6f8   :  { %1178 = vmatpush3.msra.mxu0 %v45_v24 }
 0x6f9   :  { %1179 = vmatprep.subr.mxu0 %v44_v47 }
 0x6fa   :  { %1180 = vmatpush3.msra.mxu0 %v44_v47 }
 0x6fb   :  { %1181 = vmatprep.subr.mxu0 %v43_v49 }
 0x6fc   :  { %1182 = vmatpush3.msra.mxu0 %v43_v49 }
 0x6fd   :  { %1183 = vmatprep.subr.mxu0 %v42_v62 }
 0x6fe   :  { %1184 = vmatpush3.msra.mxu0 %v42_v62 }
 0x6ff   :  { %1185 = vmatprep.subr.mxu0 %v41_v60 }
 0x700   :  { %1186 = vmatpush3.msra.mxu0 %v41_v60 }
 0x701   :  { %1187 = vmatprep.subr.mxu0 %v40_v51 }
 0x702   :  { %1188 = vmatpush3.msra.mxu0 %v40_v51 }
 0x703   :  { %1189 = vmatprep.subr.mxu0 %v39_v4 }
 0x704   :  { %1190 = vmatpush3.msra.mxu0 %v39_v4 }
 0x705   :  { %1191 = vmatprep.subr.mxu0 %v38_v53 }
 0x706   :  { %1192 = vmatpush3.msra.mxu0 %v38_v53 }
 0x707   :  { %1193 = vmatprep.subr.mxu0 %v37_v58 }
 0x708   :  { %1194 = vmatpush3.msra.mxu0 %v37_v58 }
 0x709   :  { %1195 = vmatprep.subr.mxu0 %v36_v2 }
 0x70a   :  { %1196 = vmatpush3.msra.mxu0 %v36_v2 }
 0x70b   :  { %1197 = vmatprep.subr.mxu0 %v35_v56 }
 0x70c   :  { %1198 = vmatpush3.msra.mxu0 %v35_v56 }
 0x70d   :  { %1199 = vmatprep.subr.mxu0 %v34_v55 }
 0x70e   :  { %1200 = vmatpush3.msra.mxu0 %v34_v55 }
 0x70f   :  { %1201 = vmatprep.subr.mxu0 %v33_v57 }
 0x710   :  { %1202 = vmatpush3.msra.mxu0 %v33_v57 }
 0x711   :  { %1203 = vmatprep.subr.mxu0 %v32_v54 }
 0x712   :  { %1204 = vmatpush3.msra.mxu0 %v32_v54 }
 0x713   :  { %1205 = vmatprep.subr.mxu0 %v31_v59 }
 0x714   :  { %1206 = vmatpush3.msra.mxu0 %v31_v59 }
 0x715   :  { %1207 = vmatprep.subr.mxu0 %v30_v52 }
 0x716   :  { %1208 = vmatpush3.msra.mxu0 %v30_v52 }
 0x7b7   :  { %v1176_v15 = vpop.f32.mrf.mxu0 }
 0x7b8   :  { %v853_v50 = vadd.f32 %v1176_v15, %v1005_v14 }
 0x7b9   :  { %v847_v16 = vpop.f32.mrf.mxu0 }
 0x7ba   :  { %v848_v48 = vadd.f32 %v1005_v14, %v847_v16  ;;  %v857_v61 = vmax.f32 %v853_v50, 0.0 }
 0x7bc   :  { %v856_v17 = vmax.f32 %v848_v48, 0.0 }
 0x7be   :  { %1209 = vmatprep.mubr.f32.mxu0 %v856_v17 }
 0x7bf   :  { %1210 = vmatmul.mubr.f32.vlgmr.msra.gmra.mxu0 %v857_v61 }
 0x87f   :  { %v1211_v63 = vpop.f32.mrf.mxu0 }
 0x880   :  { %v934_v40 = vadd.f32 %v1211_v63, %v1008_v46 }
 0x881   :  { %v928_v42 = vpop.f32.mrf.mxu0 }
 0x882   :  { %v938_v44 = vadd.f32 %v934_v40, %v1515_v34  ;;  %v929_v3 = vadd.f32 %v1008_v46, %v928_v42 }
 0x884   :  { %v937_v5 = vadd.f32 %v929_v3, %v1518_v36  ;;  %945 = vrot.lane.b32.xlu1 %v938_v44, %s1231_s15  ;;  %v948_v7 = vrot.slane %v938_v44, 4 }
 0x886   :  { %v940_v6 = vrot.slane %v937_v5, 4 }
 0x888   :  { %941 = vrot.lane.b32.xlu1 %v940_v6, %s1232_s21 }
 0x88c   :  { %949 = vrot.lane.b32.xlu1 %v948_v7, %s1230_s12 }
 0x8f6   :  { %v946_v8 = vpop.permute.xlu1 %945 }
 0x8fa   :  { %v942_v9 = vpop.permute.xlu1 %941 }
 0x8fb   :  { %v952_v10 = vsel %vm71_vm0, %v937_v5, %v942_v9 }
 0x8fc   :  { %v954_v11 = vsel %vm953_vm2, %v952_v10, %v946_v8 }
 0x8fe   :  { %v950_v12 = vpop.permute.xlu1 %949 }
 0x8ff   :  { %v956_v34 = vsel %vm955_vm3, %v954_v11, %v950_v12 }
 0x900   :  { %957 = vst [vmem:[%s1616_s5] sm:$0xf] %v956_v34 }

</bundles_post_ra>
